<compile_context>
chip_gen: v5e
topology: v5e:2x2
jax: 0.10.0
libtpu: 0.0.40
codegen_flags: <defaults>
</compile_context>

<pallas_src>
import math

import jax
import jax.numpy as jnp
from jax.experimental import pallas as pl
from jax.experimental.pallas import tpu as pltpu


def _round_up(n, m):
    return ((n + m - 1) // m) * m


def _v2v_full_kernel(x_ref, o_ref):
    """x_ref: (tb, nx+1, ny+1) vertex block; o_ref: (tb, nx, ny) volume block."""
    nx = o_ref.shape[1]
    # Row-shifted views loaded straight from the ref; accumulate in f32.
    lo = x_ref[:, pl.ds(0, nx), :].astype(jnp.float32)   # rows i
    hi = x_ref[:, pl.ds(1, nx), :].astype(jnp.float32)   # rows i+1
    rs = lo + hi                                         # (tb, nx, ny+1)
    o_ref[...] = (0.25 * (rs[:, :, :-1] + rs[:, :, 1:])).astype(o_ref.dtype)


def _v2v_rowtile_kernel(x_ref, halo_ref, o_ref):
    """Row-tiled variant with a 1-row halo.

    x_ref:    (tb, th, ny+1)  input rows [r*th, r*th + th)
    halo_ref: (tb, 8,  ny+1)  aligned block whose row 0 is input row r*th + th
                              (only row 0 is ever read)
    o_ref:    (tb, th, ny)
    """
    lo = x_ref[...].astype(jnp.float32)                    # (tb, th, ny+1)
    hl = halo_ref[:, pl.ds(0, 1), :].astype(jnp.float32)   # (tb, 1,  ny+1)
    cs_main = lo[:, :, :-1] + lo[:, :, 1:]                 # (tb, th, ny)
    cs_halo = hl[:, :, :-1] + hl[:, :, 1:]                 # (tb, 1,  ny)
    cs_next = jnp.concatenate([cs_main[:, 1:, :], cs_halo], axis=1)
    o_ref[...] = (0.25 * (cs_main + cs_next)).astype(o_ref.dtype)


def _vmem_limit_bytes():
    cap = 128 * 1024 * 1024
    try:
        cap = int(getattr(pltpu.get_tpu_info(), "vmem_capacity_bytes", cap))
    except Exception:
        pass
    # Leave headroom for compiler scratch: ~48 MiB on v7x (64 MiB/TC),
    # ~96 MiB on v5e/v6e (128 MiB physical).
    return max(16 * 1024 * 1024, min(cap * 3 // 4, 96 * 1024 * 1024))


def vertex_to_volume_interpolate_2d(x, *, _force_row_tile=None):
    """Pallas implementation of VertexToVolumeInterpolator2d.forward.

    x: array of shape (..., nx+1, ny+1). Returns (..., nx, ny), same dtype.
    """
    *batch_dims, hp1, wp1 = x.shape
    nx, ny = hp1 - 1, wp1 - 1
    if nx < 1 or ny < 1:
        raise ValueError(f"need at least a 2x2 vertex grid, got {x.shape}")
    B = math.prod(batch_dims) if batch_dims else 1
    dtype = x.dtype
    itemsize = jnp.dtype(dtype).itemsize

    # Leading-dim reshape only: no data movement, no transpose.
    xb = x.reshape(B, hp1, wp1)

    vmem_limit = _vmem_limit_bytes()
    budget = vmem_limit // 3   # double-buffered blocks + in-kernel f32 temps

    # Padded (sublane x lane) VMEM footprint of one batch element when the
    # whole spatial slab is a single block (incl. double buffering + temps).
    wpad = _round_up(wp1, 128)
    in_bytes = _round_up(hp1, 8) * wpad * itemsize
    out_bytes = _round_up(nx, 8) * _round_up(ny, 128) * itemsize
    tmp_bytes = 4 * _round_up(nx, 8) * wpad * 4
    per_b_full = 2 * (in_bytes + out_bytes) + tmp_bytes

    def _params(sem):
        return pltpu.CompilerParams(dimension_semantics=sem,
                                    vmem_limit_bytes=vmem_limit)

    row_tiled = _force_row_tile is not None or (
        nx >= 16 and (per_b_full > budget or B == 1))

    if not row_tiled:
        # --- batch-tiled path: full spatial slab per block ------------------
        tb = max(1, budget // per_b_full)
        if B >= 2:
            tb = min(tb, pl.cdiv(B, 2))  # >= 2 grid steps (v7x has 2 TCs)
        tb = min(tb, B)
        grid = (pl.cdiv(B, tb),)
        out = pl.pallas_call(
            _v2v_full_kernel,
            out_shape=jax.ShapeDtypeStruct((B, nx, ny), dtype),
            grid=grid,
            in_specs=[pl.BlockSpec((tb, hp1, wp1), lambda b: (b, 0, 0))],
            out_specs=pl.BlockSpec((tb, nx, ny), lambda b: (b, 0, 0)),
            compiler_params=_params(("parallel",)),
        )(xb)
    else:
        # --- row-tiled path: 1-row halo via a second aligned BlockSpec ------
        if _force_row_tile is not None:
            th = int(_force_row_tile)
        else:
            row_bytes = (2 * wpad * itemsize                 # input rows (x2 buf)
                         + 2 * _round_up(ny, 128) * itemsize  # output rows
                         + 3 * wpad * 4)                      # f32 temps
            halo_bytes = 2 * 8 * wpad * itemsize
            th = max(8, ((budget - halo_bytes) // max(1, row_bytes)) // 8 * 8)
            # Keep at least two row blocks so both v7x cores stay busy.
            th = min(th, _round_up(max(nx // 2, 1), 8))
        th = max(8, (th // 8) * 8)
        nr = pl.cdiv(nx, th)
        halo_max = pl.cdiv(hp1, 8) - 1   # last valid 8-row block index

        def halo_map(b, r, _tb8=th // 8, _hm=halo_max):
            # First row of this block is input row (r+1)*th (the halo row).
            # Clamp so the ragged final output block never issues an OOB DMA
            # (its halo only feeds masked-out output rows anyway).
            return (b, jnp.minimum((r + 1) * _tb8, _hm), 0)

        grid = (B, nr)
        out = pl.pallas_call(
            _v2v_rowtile_kernel,
            out_shape=jax.ShapeDtypeStruct((B, nx, ny), dtype),
            grid=grid,
            in_specs=[
                pl.BlockSpec((1, th, wp1), lambda b, r: (b, r, 0)),
                pl.BlockSpec((1, 8, wp1), halo_map),
            ],
            out_specs=pl.BlockSpec((1, th, ny), lambda b, r: (b, r, 0)),
            compiler_params=_params(("parallel", "parallel")),
        )(xb, xb)

    # TODO(synk): add lane (column) tiling with a 1-column halo for the rare
    # case where ny+1 is so large that even an 8-row block exceeds the budget.
    return out.reshape(*batch_dims, nx, ny)


def _reference(x):
    return 0.25 * (x[..., :-1, :-1] + x[..., 1:, :-1]
                   + x[..., :-1, 1:] + x[..., 1:, 1:])


if __name__ == "__main__":
    key = jax.random.PRNGKey(0)

    # Primary check: batch=2, channels=4, 17x17 vertex grid -> 16x16 volumes.
    x = jax.random.normal(key, (2, 4, 17, 17), dtype=jnp.float32)
    y = jax.block_until_ready(vertex_to_volume_interpolate_2d(x))
    assert y.shape == (2, 4, 16, 16), y.shape
    assert jnp.allclose(y, _reference(x), atol=1e-5, rtol=1e-5)

    # Row-tiled (halo) path with ragged row blocks and odd spatial sizes.
    x2 = jax.random.normal(jax.random.PRNGKey(0), (3, 37, 41), dtype=jnp.float32)
    y2 = jax.block_until_ready(
        vertex_to_volume_interpolate_2d(x2, _force_row_tile=16))
    assert y2.shape == (3, 36, 40), y2.shape
    assert jnp.allclose(y2, _reference(x2), atol=1e-5, rtol=1e-5)

    # No-batch-dims input (B == 1 triggers the row-split path for v7x).
    x3 = x[0, 0]
    y3 = jax.block_until_ready(vertex_to_volume_interpolate_2d(x3))
    assert y3.shape == (16, 16), y3.shape
    assert jnp.allclose(y3, _reference(x3), atol=1e-5, rtol=1e-5)

    print("KERNEL_OK")
</pallas_src>

<mosaic_0001>
module attributes {stable_mosaic.version = 11 : i64} {
  func.func @_v2v_full_kernel(%arg0: i32, %arg1: memref<4x17x17xf32, #tpu.memory_space<vmem>>, %arg2: memref<4x16x16xf32, #tpu.memory_space<vmem>>) attributes {dimension_semantics = [#tpu.dimension_semantics<parallel>], iteration_bounds = array<i64: 2>, scalar_prefetch = 0 : i64, scratch_operands = 0 : i64, tpu.core_type = #tpu.core_type<tc>, window_params = [{transform_indices = @transform_0, window_bounds = array<i64: 4, 17, 17>}, {transform_indices = @transform_1, window_bounds = array<i64: 4, 16, 16>}]} {
    %c0 = arith.constant 0 : index
    %c0_0 = arith.constant 0 : index
    %c0_1 = arith.constant 0 : index
    %0 = vector.load %arg1[%c0, %c0_0, %c0_1] : memref<4x17x17xf32, #tpu.memory_space<vmem>>, vector<4x16x17xf32>
    %c0_2 = arith.constant 0 : index
    %c1 = arith.constant 1 : index
    %c0_3 = arith.constant 0 : index
    %1 = vector.load %arg1[%c0_2, %c1, %c0_3] : memref<4x17x17xf32, #tpu.memory_space<vmem>>, vector<4x16x17xf32>
    %2 = arith.addf %0, %1 : vector<4x16x17xf32>
    %3 = vector.extract_strided_slice %2 {offsets = [0, 0, 0], sizes = [4, 16, 16], strides = [1, 1, 1]} : vector<4x16x17xf32> to vector<4x16x16xf32>
    %4 = vector.extract_strided_slice %2 {offsets = [0, 0, 1], sizes = [4, 16, 16], strides = [1, 1, 1]} : vector<4x16x17xf32> to vector<4x16x16xf32>
    %5 = arith.addf %3, %4 : vector<4x16x16xf32>
    %cst = arith.constant 2.500000e-01 : f32
    %6 = vector.broadcast %cst : f32 to vector<4x16x16xf32>
    %7 = arith.mulf %6, %5 : vector<4x16x16xf32>
    %c0_4 = arith.constant 0 : index
    %c0_5 = arith.constant 0 : index
    %c0_6 = arith.constant 0 : index
    %8 = vector.load %arg2[%c0_4, %c0_5, %c0_6] : memref<4x16x16xf32, #tpu.memory_space<vmem>>, vector<4x16x16xf32>
    tpu.vector_store %arg2[%c0_4, %c0_5, %c0_6], %7 {strides = array<i32>} : memref<4x16x16xf32, #tpu.memory_space<vmem>>, vector<4x16x16xf32>,
    return
  }
  func.func @transform_0(%arg0: i32) -> (i32, i32, i32) {
    %c0_i32 = arith.constant 0 : i32
    %c0_i32_0 = arith.constant 0 : i32
    %c0_i32_1 = arith.constant 0 : i32
    return %arg0, %c0_i32, %c0_i32_0 : i32, i32, i32
  }
  func.func @transform_1(%arg0: i32) -> (i32, i32, i32) {
    %c0_i32 = arith.constant 0 : i32
    %c0_i32_0 = arith.constant 0 : i32
    %c0_i32_1 = arith.constant 0 : i32
    return %arg0, %c0_i32, %c0_i32_0 : i32, i32, i32
  }
}

</mosaic_0001>

<bundles_post_ra>
// kernel: tpu_custom_call.1
= control target key start
LH: loop header
LB: loop body
LE: loop exit
PB: predicated region body
PF: predicated region fallthrough
CT: control target
= control target key end

     0   :  { %6 = vsyncpa [#allocation3], 0  ;;  %s523_s0 = inlined_call_operand.vmem [shape: f32[8,17,17], index: 0, kind: input, shape index: {}]   ;;  %s524_s1 = inlined_call_operand.hbm [shape: f32[8,16,16], index: 1, kind: output, shape index: {}]  }
   0x1   :  { %8 = vsyncpa [#allocation3 + $0x1], 0  ;;  %s416_s6 = smov 0   ;;  %s418_s7 = smov 0  }
   0x2   :  { %s420_s8 = smov 0   ;;  %s422_s9 = smov 0  }
   0x3 LB: > { %s437_s10 = sadd.s32 4294967295, %s401_s9   ;;  %s281_s11 = sadd.s32 4294967294, %s401_s9   ;;  %s401_s9 = sphi %s422_s9, %s530_s9   ;;  %s397_s8 = sphi %s420_s8, %s529_s8   ;;  %s393_s7 = sphi %s418_s7, %s528_s7   ;;  %s389_s6 = sphi %s416_s6, %s527_s6  }
   0x4   : > { %s441_s12 = sadd.s32 1, %s401_s9   ;;  %s47_s13 = sadd.s32 1, %s397_s8 }
   0x5   : > { %s44_s14 = ssub.s32 %s401_s9, %s441_s12  ;;  %p57_p0 = scmp.ne.s32.totalorder %s397_s8, %s393_s7 }
   0x6   : > { %p45_p1 = scmp.eq.s32.totalorder %s44_s14, 0  ;;  %p58_p2 = scmp.eq.s32.totalorder %s437_s10, 1 }
   0x7   : > { %p63_p3 = scmp.ne.s32.totalorder %s393_s7, %s389_s6  ;;  %p64_p4 = scmp.eq.s32.totalorder %s281_s11, 1 }
   0x8   : > { %s452_s15 = scalar_select %p45_p1, %s397_s8, %s47_s13  }
   0x9   : > { %p454_p5 = por %p58_p2, %p57_p0  ;;  %p458_p6 = por %p64_p4, %p63_p3 }
   0xa   : > { %p284_p7 = scmp.ge.s32.totalorder %s401_s9, 1  ;;  %p92_p8 = scmp.lt.s32.totalorder %s401_s9, 3 }
   0xc   : > { %p93_p9 = pnand %p284_p7, %p92_p8 }
   0xd   : > { %s286_s18 = sshll.u32 (!%p93_p9), %s437_s10, 2  ;;  %s403_s23 = smov (!%p93_p9), 127  }
   0xe   : > { %96 = sbr.rel (%p93_p9) target bundleno = 167 (0xa7), region = 24  ;;  %p114_p10 = scmp.lt.s32.totalorder (!%p93_p9), %s286_s18, 7 }
   0xf   : > { %s110_s24 = sand.u32 (!%p93_p9), 1, %s393_s7   ;;  %s295_s27 = sshll.u32 (!%p93_p9), %s437_s10, 6 }
  0x10   : > { %s285_s25 = sshll.u32 (!%p93_p9), %s110_s24, 6  ;;  %s215_s30 = scalar_lea.hbm (!%p93_p9), %s524_s1, %s295_s27 }
  0x11   : > { %s471_s26 = scalar_lea.vmem (!%p93_p9), [#allocation2], %s285_s25  ;;  %s218_s3 = sshll.u32 (!%p93_p9), %s215_s30, 4  ;;  %s219_s3 = int_to_ptr.hbm [resolvable:$true] %s218_s3 }
  0x12   : > { %s216_s2 = sshll.u32 (!%p93_p9), %s471_s26, 4  ;;  %s203_s4 = scalar_lea.sflag (!%p93_p9), [#allocation3], %s110_s24  ;;  %s217_s2 = int_to_ptr.vmem [resolvable:$true] %s216_s2 }
  0x13   : > { %s532_s18 = smov (!%p114_p10, %s286_s18), 7  ;;  %vm193_vm0 = vcmask 130048   ;;  %s353_s5 = sshra.s32 %s219_s3, 4  ;;  %s354_s5 = int_to_ptr.hbm [resolvable:$true] %s353_s5 }
  0x14   : > { %s296_s19 = smul.u32 24, %s532_s18  ;;  %s355_s10 = scalar_lea.hbm %s354_s5, 64 }
  0x15   : > { %p356_p11 = scmp.ne.s32.totalorder %s354_s5, %s355_s10  ;;  %s359_s14 = scalar_lea.hbm %s524_s1, 128 }
  0x16   : > { %s118_s22 = scalar_lea.vmem %s523_s0, %s296_s19  ;;  %p360_p0 = scmp.lt.s32.totalorder %s354_s5, %s524_s1 }
  0x17   : > { %v123_v0 = vld [vmem:[%s118_s22 + $0x18] sm:$0xff]  ;;  %v121_v2 = vld [vmem:[%s118_s22] sm:$0xff]  ;;  %v125_v8 = vld [vmem:[%s118_s22 + $0x30] sm:$0xff]  ;;  %p357_p12 = pnand %p356_p11, %p454_p5  ;;  %p361_p1 = scmp.lt.s32.totalorder %s359_s14, %s355_s10 }
  0x18   : > { %v131_v1 = vld [vmem:[%s118_s22 + $0x19] sm:$0xff]  ;;  %v129_v4 = vld [vmem:[%s118_s22 + $0x1] sm:$0xff]  ;;  %v133_v9 = vld [vmem:[%s118_s22 + $0x31] sm:$0xff] }
  0x19   : > { %v139_v3 = vadd.f32 %v131_v1, %v123_v0  ;;  %v137_v5 = vadd.f32 %v129_v4, %v121_v2  ;;  %v124_v6 = vld [vmem:[%s118_s22 + $0x20] sm:$0xff]  ;;  %v122_v10 = vld [vmem:[%s118_s22 + $0x8] sm:$0xff]  ;;  %v141_v12 = vadd.f32 %v133_v9, %v125_v8  ;;  %v126_v15 = vld [vmem:[%s118_s22 + $0x38] sm:$0xff]  ;;  %p358_p13 = pneg %p357_p12  ;;  %p362_p2 = por %p361_p1, %p360_p0 }
  0x1a   : > { %v132_v7 = vld [vmem:[%s118_s22 + $0x21] sm:$0xff]  ;;  %v130_v11 = vld [vmem:[%s118_s22 + $0x9] sm:$0xff]  ;;  %v134_v16 = vld [vmem:[%s118_s22 + $0x39] sm:$0xff] }
  0x1b   : > { %157 = vrot.lane.b32.xlu1 %v139_v3, %s403_s23  ;;  %153 = vrot.lane.b32.xlu0 %v137_v5, %s403_s23  ;;  %v140_v13 = vadd.f32 %v132_v7, %v124_v6  ;;  %v138_v14 = vadd.f32 %v130_v11, %v122_v10  ;;  %v142_v17 = vadd.f32 %v134_v16, %v126_v15  ;;  %v128_v18 = vld [vmem:[%s118_s22 + $0x50] sm:$0xff]  ;;  %v127_v20 = vld [vmem:[%s118_s22 + $0x48] sm:$0xff]  ;;  %p363_p3 = pnand %p362_p2, %p358_p13 }
  0x1c   : > { %161 = vrot.lane.b32.xlu2 %v141_v12, %s403_s23  ;;  %v136_v19 = vld [vmem:[%s118_s22 + $0x51] sm:$0xff]  ;;  %v135_v21 = vld [vmem:[%s118_s22 + $0x49] sm:$0xff] }
  0x1d   : > { %v144_v22 = vadd.f32 %v136_v19, %v128_v18  ;;  %v143_v23 = vadd.f32 %v135_v21, %v127_v20 }
  0x23   : > { %159 = vrot.lane.b32.xlu1 %v140_v13, %s403_s23  ;;  %155 = vrot.lane.b32.xlu0 %v138_v14, %s403_s23 }
  0x24   : > { %163 = vrot.lane.b32.xlu2 %v142_v17, %s403_s23 }
  0x2b   : > { %167 = vrot.lane.b32.xlu1 %v144_v22, %s403_s23  ;;  %165 = vrot.lane.b32.xlu0 %v143_v23, %s403_s23 }
  0x76   : > { %v162_v24 = vpop.permute.xlu2 %161 }
  0x77   : > { %v181_v25 = vadd.f32 %v162_v24, %v141_v12 }
  0x79   : > { %v189_v26 = vmul.f32 0.25, %v181_v25 }
  0x7b   : > { %198 = vst.msk [vmem:[%s471_s26 + $0x20] sm:$0xff] %vm193_vm0, %v189_v26 }
  0x7e   : > { %v164_v27 = vpop.permute.xlu2 %163 }
  0x7f   : > { %v182_v28 = vadd.f32 %v164_v27, %v142_v17 }
  0x81   : > { %v190_v29 = vmul.f32 0.25, %v182_v28 }
  0x83   : > { %199 = vst.msk [vmem:[%s471_s26 + $0x28] sm:$0xff] %vm193_vm0, %v190_v29 }
  0x8d   : > { %v158_v30 = vpop.permute.xlu1 %157  ;;  %v154_v32 = vpop.permute.xlu0 %153 }
  0x8e   : > { %v179_v31 = vadd.f32 %v158_v30, %v139_v3  ;;  %v177_v33 = vadd.f32 %v154_v32, %v137_v5 }
  0x90   : > { %v187_v34 = vmul.f32 0.25, %v179_v31  ;;  %v185_v35 = vmul.f32 0.25, %v177_v33 }
  0x92   : > { %196 = vst.msk [vmem:[%s471_s26 + $0x10] sm:$0xff] %vm193_vm0, %v187_v34 }
  0x93   : > { %194 = vst.msk [vmem:[%s471_s26] sm:$0xff] %vm193_vm0, %v185_v35 }
  0x95   : > { %v160_v36 = vpop.permute.xlu1 %159  ;;  %v156_v38 = vpop.permute.xlu0 %155 }
  0x96   : > { %v180_v37 = vadd.f32 %v160_v36, %v140_v13  ;;  %v178_v39 = vadd.f32 %v156_v38, %v138_v14 }
  0x98   : > { %v188_v40 = vmul.f32 0.25, %v180_v37  ;;  %v186_v41 = vmul.f32 0.25, %v178_v39 }
  0x9a   : > { %197 = vst.msk [vmem:[%s471_s26 + $0x18] sm:$0xff] %vm193_vm0, %v188_v40 }
  0x9b   : > { %195 = vst.msk [vmem:[%s471_s26 + $0x8] sm:$0xff] %vm193_vm0, %v186_v41 }
  0x9d   : > { %v168_v42 = vpop.permute.xlu1 %167  ;;  %v166_v44 = vpop.permute.xlu0 %165 }
  0x9e   : > { %v184_v43 = vadd.f32 %v168_v42, %v144_v22  ;;  %v183_v45 = vadd.f32 %v166_v44, %v143_v23 }
  0xa0   : > { %v192_v46 = vmul.f32 0.25, %v184_v43  ;;  %v191_v47 = vmul.f32 0.25, %v183_v45 }
  0xa2   : > { %201 = vst.msk [vmem:[%s471_s26 + $0x38] sm:$0xff] %vm193_vm0, %v192_v46 }
  0xa3   : > { %200 = vst.msk [vmem:[%s471_s26 + $0x30] sm:$0xff] %vm193_vm0, %v191_v47 }
  0xa4   : > { %366 = shalt.err (!%p363_p3)
}
  0xa5   : > { %s404_s20 = smov 128   ;;  %s405_s21 = smov 8  }
  0xa6   : > { %297 = dma.vmem_to_hbm [thread:$0]  (%p454_p5), %s217_s2, 1024, %s219_s3, %s203_s4, %s404_s20, %s404_s20, %s405_s21  }
  0xa7 PF: > { %p303_p4 = scmp.ge.s32.totalorder %s401_s9, 2  ;;  %s233_s22 = sand.u32 1, %s389_s6  }
  0xa8   : > { %s234_s23 = scalar_lea.sflag [#allocation3], %s233_s22 }
  0xa9   : > { %p300_p7 = pnand %p303_p4, %p458_p6 }
  0xab   : > { %p301_p8 = pneg %p300_p7 }
  0xad   : > { %384 = dma.done.wait (%p301_p8), %s234_s23, 1024  }
  0xae   : > { %386 = vsyncadd (%p301_p8), %s234_s23, 4294966272  ;;  %p11_p9 = scmp.ge.s32.totalorder %s441_s12, 4   ;;  %s527_s6 = smov %s393_s7 }
  0xaf   : > { %s528_s7 = smov %s397_s8  ;;  %s529_s8 = smov %s452_s15 }
  0xb0   : > { %s530_s9 = smov %s441_s12  ;;  %13 = sbr.rel (!%p11_p9) target bundleno = 3 (0x3), region = 59 }
  0xb5   :  { %240 = vsyncpa [#allocation3], 1 }
  0xb6   :  { %242 = vsyncpa [#allocation3 + $0x1], 1 }

</bundles_post_ra>
